<compile_context>
chip_gen: v7x
topology: tpu7x:2x2x1
jax: 0.10.0
libtpu: 0.0.40
codegen_flags: <defaults>
</compile_context>

<pallas_src>
import jax
import jax.numpy as jnp
from jax.experimental import pallas as pl
from jax.experimental.pallas import tpu as pltpu

# ----------------------------- configuration --------------------------------
MEASUREMENT_LEN = 32          # args.measurement_len
HIDDEN = 128                  # MLP hidden width
DIFT_CODE_LEN = 16            # dift_code_config['cat'][0] = 16 (local 9 + global 7)
OUT_PAD = 128                 # lane-dense padded output width (zero-padded cols)


def _round_up(x, m):
    return ((x + m - 1) // m) * m


def _ceil_div(a, b):
    return -(-a // b)


def _device_info():
    """(is_v7x, multi_tensorcore_chip) from the local device kind string."""
    try:
        kind = jax.devices()[0].device_kind.lower()
    except Exception:  # pragma: no cover - defensive
        kind = ""
    is_v7 = "v7" in kind
    multi_tc = is_v7 or ("v4" in kind) or ("v5p" in kind)
    return is_v7, multi_tc


# ------------------------------ Pallas kernel --------------------------------
def dift_kernel(meas_ref, ang_ref,
                w1m_ref, w1c_ref, b1_ref,
                w2_ref, b2_ref,
                w3_ref, b3_ref,
                out_ref):
    """One batch tile per grid step; weights are VMEM-resident.

    meas_ref : (TB, M)   f32   measurements (batch_data squeezed)
    ang_ref  : (TB, 1)   f32   sampled rotate angles
    w1m_ref  : (M, H)    bf16  first-layer weights for the measurement part
    w1c_ref  : (2, H)    f32   first-layer weights for [sin, cos] part (VPU path)
    b1_ref   : (1, H)    f32
    w2_ref   : (H, H) bf16, b2_ref : (1, H) f32
    w3_ref   : (H, 128) bf16 (zero-padded cols 16..127), b3_ref : (1, 128) f32
    out_ref  : (TB, 128) bf16  lane-dense padded dift codes
    """
    meas = meas_ref[...]                     # (TB, M) f32
    ang = ang_ref[...]                       # (TB, 1) f32

    s = jnp.sin(ang)                         # (TB, 1) f32 (EUP)
    c = jnp.cos(ang)                         # (TB, 1) f32

    # Concatenation [meas | sin | cos] @ W1 expressed as a split matmul:
    # the measurement part goes through the MXU in bf16, the 2-column cossin
    # part is a cheap f32 VPU broadcast-add (avoids a lane-axis concat / XLU,
    # and avoids padding K which would only multiply input DMA bytes).
    h = jnp.dot(meas.astype(jnp.bfloat16), w1m_ref[...],
                preferred_element_type=jnp.float32)
    h = h + s * w1c_ref[0:1, :] + c * w1c_ref[1:2, :] + b1_ref[...]
    h = jnp.maximum(h, 0.01 * h)             # leaky relu (mul+max on VPU)

    h = jnp.dot(h.astype(jnp.bfloat16), w2_ref[...],
                preferred_element_type=jnp.float32) + b2_ref[...]
    h = jnp.maximum(h, 0.01 * h)

    o = jnp.dot(h.astype(jnp.bfloat16), w3_ref[...],
                preferred_element_type=jnp.float32) + b3_ref[...]
    out_ref[...] = o.astype(out_ref.dtype)   # unmasked full-vreg bf16 stores (128 lanes)


# ------------------------------- wrapper --------------------------------------
def dift_net_inuse_forward(batch_data, sampled_rotate_angles, params, *, tb=None):
    """batch_data: (B, M, 1) f32; sampled_rotate_angles: (B, 1) f32 -> (B, 16) f32."""
    B, M, _ = batch_data.shape
    meas = batch_data.reshape(B, M)          # glue reshape stays in JAX
    angles = sampled_rotate_angles.reshape(B, 1)

    is_v7, multi_tc = _device_info()

    # ----- batch tile selection ---------------------------------------------
    # Large tiles amortize the ~0.35 us per-grid-step pipeline overhead.
    # v7x has 64 MiB VMEM/TC -> cap 2048; v5e/v6e (128 MiB) -> cap 8192.
    if tb is None:
        max_tb = 2048 if is_v7 else 8192
        tb = min(max_tb, _round_up(B, 16))
        if multi_tc:
            # keep >= 2 grid steps so both TensorCores get work
            tb = min(tb, max(16, _round_up(_ceil_div(B, 2), 16)))
    tb = max(16, _round_up(tb, 16))          # bf16 output tile: sublane mult of 16

    # On multi-TC chips pad the grid to an even number of steps (CORE_PARALLEL).
    step_mult = 2 * tb if multi_tc else tb
    Bp = _round_up(B, step_mult)
    if Bp != B:                              # zero-pad ragged batch tail
        meas = jnp.pad(meas, ((0, Bp - B), (0, 0)))
        angles = jnp.pad(angles, ((0, Bp - B), (0, 0)))

    H = params["w2"].shape[0]
    OUTP = params["w3"].shape[1]
    grid = (Bp // tb,)

    # ----- VMEM budget derived from the tile ---------------------------------
    weight_bytes = sum(int(v.size) * v.dtype.itemsize for v in params.values())
    # 2x double-buffered input/output tiles + a few f32 hidden intermediates.
    per_row = 2 * (M * 4 + 4 + OUTP * 2) + 6 * H * 4
    vmem_needed = per_row * tb + 2 * weight_bytes + (2 << 20)
    vmem_cap = (48 << 20) if is_v7 else (96 << 20)
    vmem_limit = int(min(vmem_cap, max(16 << 20, vmem_needed)))

    flops = 2 * Bp * (M * H + H * H + H * OUTP)
    bytes_accessed = (meas.size * 4 + angles.size * 4
                      + Bp * OUTP * 2 + weight_bytes)

    if multi_tc:
        # CORE_PARALLEL shards the batch grid axis across the 2 TensorCores.
        dim_sem = (getattr(pltpu, "CORE_PARALLEL", "parallel"),)
    else:
        dim_sem = ("parallel",)              # no-op on 1-TC chips, harmless

    full = lambda shape: pl.BlockSpec(shape, lambda i: (0, 0))  # VMEM-resident weights

    out = pl.pallas_call(
        dift_kernel,
        out_shape=jax.ShapeDtypeStruct((Bp, OUTP), jnp.bfloat16),
        grid=grid,
        in_specs=[
            pl.BlockSpec((tb, M), lambda i: (i, 0)),     # measurements tile
            pl.BlockSpec((tb, 1), lambda i: (i, 0)),     # angles tile
            full(params["w1m"].shape),
            full(params["w1c"].shape),
            full(params["b1"].shape),
            full(params["w2"].shape),
            full(params["b2"].shape),
            full(params["w3"].shape),
            full(params["b3"].shape),
        ],
        out_specs=pl.BlockSpec((tb, OUTP), lambda i: (i, 0)),
        compiler_params=pltpu.CompilerParams(
            dimension_semantics=dim_sem,
            vmem_limit_bytes=vmem_limit,
        ),
        cost_estimate=pl.CostEstimate(
            flops=flops, transcendentals=2 * Bp, bytes_accessed=bytes_accessed),
    )(meas, angles,
      params["w1m"], params["w1c"], params["b1"],
      params["w2"], params["b2"],
      params["w3"], params["b3"])

    # drop batch pad + zero lanes, return f32 codes
    return out[:B, :DIFT_CODE_LEN].astype(jnp.float32)


def init_params(key):
    """Deterministic synthetic parameters.

    Matmul weights are bf16 (MXU); w1c / biases stay f32 (VPU elementwise path).
    w3/b3 are zero-padded to 128 output lanes for unmasked stores.
    """
    ks = jax.random.split(key, 7)
    scale1 = 1.0 / jnp.sqrt(MEASUREMENT_LEN + 2)
    scale2 = 1.0 / jnp.sqrt(HIDDEN)

    w3 = jax.random.normal(ks[3], (HIDDEN, DIFT_CODE_LEN), jnp.float32) * scale2
    w3p = jnp.zeros((HIDDEN, OUT_PAD), jnp.float32).at[:, :DIFT_CODE_LEN].set(w3)
    b3 = jax.random.normal(ks[6], (1, DIFT_CODE_LEN), jnp.float32) * 0.1
    b3p = jnp.zeros((1, OUT_PAD), jnp.float32).at[:, :DIFT_CODE_LEN].set(b3)

    return {
        "w1m": (jax.random.normal(ks[0], (MEASUREMENT_LEN, HIDDEN), jnp.float32)
                * scale1).astype(jnp.bfloat16),
        "w1c": jax.random.normal(ks[1], (2, HIDDEN), jnp.float32) * scale1,
        "b1": jax.random.normal(ks[4], (1, HIDDEN), jnp.float32) * 0.1,
        "w2": (jax.random.normal(ks[2], (HIDDEN, HIDDEN), jnp.float32)
               * scale2).astype(jnp.bfloat16),
        "b2": jax.random.normal(ks[5], (1, HIDDEN), jnp.float32) * 0.1,
        "w3": w3p.astype(jnp.bfloat16),
        "b3": b3p,
    }


def reference_forward(batch_data, angles, params):
    """Pure-JAX reference replicating the kernel math (concat-as-split-matmul MLP).

    Note: replays the kernel's bf16 MXU casts and bf16 output rounding, so it
    checks the kernel plumbing; it is not an f32-exact PyTorch reference.
    """
    B, M, _ = batch_data.shape
    meas = batch_data.reshape(B, M)
    s = jnp.sin(angles.reshape(B, 1))
    c = jnp.cos(angles.reshape(B, 1))
    h = jnp.dot(meas.astype(jnp.bfloat16), params["w1m"],
                preferred_element_type=jnp.float32)
    h = h + s * params["w1c"][0:1, :] + c * params["w1c"][1:2, :] + params["b1"]
    h = jnp.maximum(h, 0.01 * h)
    h = jnp.dot(h.astype(jnp.bfloat16), params["w2"],
                preferred_element_type=jnp.float32) + params["b2"]
    h = jnp.maximum(h, 0.01 * h)
    o = jnp.dot(h.astype(jnp.bfloat16), params["w3"],
                preferred_element_type=jnp.float32) + params["b3"]
    return o[:, :DIFT_CODE_LEN].astype(jnp.bfloat16).astype(jnp.float32)


if __name__ == "__main__":
    key = jax.random.PRNGKey(0)
    k_data, k_ang, k_param = jax.random.split(key, 3)

    # Small shapes; explicit tb=16 forces a multi-step grid plus ragged-tail padding.
    B = 40
    batch_data = jax.random.normal(k_data, (B, MEASUREMENT_LEN, 1), jnp.float32)
    sampled_rotate_angles = jax.random.uniform(
        k_ang, (B, 1), jnp.float32, minval=0.0, maxval=2.0 * jnp.pi)

    params = init_params(k_param)
    ref = reference_forward(batch_data, sampled_rotate_angles, params)

    # (a) multi-step grid path (small tile forced)
    codes_small = dift_net_inuse_forward(
        batch_data, sampled_rotate_angles, params, tb=16)
    codes_small = jax.block_until_ready(codes_small)
    assert codes_small.shape == (B, DIFT_CODE_LEN)
    assert jnp.allclose(codes_small, ref, atol=2e-2, rtol=2e-2), "mismatch (tb=16)"

    # (b) default large-tile path (single or few grid steps)
    codes_big = dift_net_inuse_forward(batch_data, sampled_rotate_angles, params)
    codes_big = jax.block_until_ready(codes_big)
    assert codes_big.shape == (B, DIFT_CODE_LEN)
    assert jnp.allclose(codes_big, ref, atol=2e-2, rtol=2e-2), "mismatch (default tb)"

    print("KERNEL_OK")
</pallas_src>

<mosaic_0001>
module attributes {stable_mosaic.version = 11 : i64} {
  func.func @dift_kernel(%arg0: i32, %arg1: memref<16x32xf32, #tpu.memory_space<vmem>>, %arg2: memref<16x1xf32, #tpu.memory_space<vmem>>, %arg3: memref<32x128xbf16, #tpu.memory_space<vmem>>, %arg4: memref<2x128xf32, #tpu.memory_space<vmem>>, %arg5: memref<1x128xf32, #tpu.memory_space<vmem>>, %arg6: memref<128x128xbf16, #tpu.memory_space<vmem>>, %arg7: memref<1x128xf32, #tpu.memory_space<vmem>>, %arg8: memref<128x128xbf16, #tpu.memory_space<vmem>>, %arg9: memref<1x128xf32, #tpu.memory_space<vmem>>, %arg10: memref<16x128xbf16, #tpu.memory_space<vmem>>) attributes {dimension_semantics = [#tpu.dimension_semantics<parallel>], iteration_bounds = array<i64: 3>, scalar_prefetch = 0 : i64, scratch_operands = 0 : i64, tpu.core_type = #tpu.core_type<tc>, window_params = [{transform_indices = @transform_0, window_bounds = array<i64: 16, 32>}, {transform_indices = @transform_1, window_bounds = array<i64: 16, 1>}, {pipeline_mode = #tpu.pipeline_mode<synchronous>, transform_indices = @transform_2, window_bounds = array<i64: 32, 128>}, {pipeline_mode = #tpu.pipeline_mode<synchronous>, transform_indices = @transform_3, window_bounds = array<i64: 2, 128>}, {pipeline_mode = #tpu.pipeline_mode<synchronous>, transform_indices = @transform_4, window_bounds = array<i64: 1, 128>}, {pipeline_mode = #tpu.pipeline_mode<synchronous>, transform_indices = @transform_5, window_bounds = array<i64: 128, 128>}, {pipeline_mode = #tpu.pipeline_mode<synchronous>, transform_indices = @transform_6, window_bounds = array<i64: 1, 128>}, {pipeline_mode = #tpu.pipeline_mode<synchronous>, transform_indices = @transform_7, window_bounds = array<i64: 128, 128>}, {pipeline_mode = #tpu.pipeline_mode<synchronous>, transform_indices = @transform_8, window_bounds = array<i64: 1, 128>}, {transform_indices = @transform_9, window_bounds = array<i64: 16, 128>}]} {
    %c0 = arith.constant 0 : index
    %c0_0 = arith.constant 0 : index
    %0 = vector.load %arg1[%c0, %c0_0] : memref<16x32xf32, #tpu.memory_space<vmem>>, vector<16x32xf32>
    %c0_1 = arith.constant 0 : index
    %c0_2 = arith.constant 0 : index
    %1 = vector.load %arg2[%c0_1, %c0_2] : memref<16x1xf32, #tpu.memory_space<vmem>>, vector<16x1xf32>
    %2 = math.sin %1 : vector<16x1xf32>
    %3 = math.cos %1 : vector<16x1xf32>
    %4 = arith.truncf %0 : vector<16x32xf32> to vector<16x32xbf16>
    %c0_3 = arith.constant 0 : index
    %c0_4 = arith.constant 0 : index
    %5 = vector.load %arg3[%c0_3, %c0_4] : memref<32x128xbf16, #tpu.memory_space<vmem>>, vector<32x128xbf16>
    %cst = arith.constant dense<0.000000e+00> : vector<16x128xf32>
    %6 = tpu.matmul %4, %5, %cst {dimension_numbers = #tpu.dot_dimension_numbers<[1], [0], [0], [1], [0, 0, 1, 1], [], []>} : vector<16x32xbf16>, vector<32x128xbf16>, vector<16x128xf32> -> vector<16x128xf32>
    %c0_5 = arith.constant 0 : index
    %c0_6 = arith.constant 0 : index
    %7 = vector.load %arg4[%c0_5, %c0_6] : memref<2x128xf32, #tpu.memory_space<vmem>>, vector<1x128xf32>
    %8 = vector.broadcast %2 : vector<16x1xf32> to vector<16x128xf32>
    %9 = vector.broadcast %7 : vector<1x128xf32> to vector<16x128xf32>
    %10 = arith.mulf %8, %9 : vector<16x128xf32>
    %11 = arith.addf %6, %10 : vector<16x128xf32>
    %c1 = arith.constant 1 : index
    %c0_7 = arith.constant 0 : index
    %12 = vector.load %arg4[%c1, %c0_7] : memref<2x128xf32, #tpu.memory_space<vmem>>, vector<1x128xf32>
    %13 = vector.broadcast %3 : vector<16x1xf32> to vector<16x128xf32>
    %14 = vector.broadcast %12 : vector<1x128xf32> to vector<16x128xf32>
    %15 = arith.mulf %13, %14 : vector<16x128xf32>
    %16 = arith.addf %11, %15 : vector<16x128xf32>
    %c0_8 = arith.constant 0 : index
    %c0_9 = arith.constant 0 : index
    %17 = vector.load %arg5[%c0_8, %c0_9] : memref<1x128xf32, #tpu.memory_space<vmem>>, vector<1x128xf32>
    %18 = vector.broadcast %17 : vector<1x128xf32> to vector<16x128xf32>
    %19 = arith.addf %16, %18 : vector<16x128xf32>
    %cst_10 = arith.constant 0.00999999977 : f32
    %20 = vector.broadcast %cst_10 : f32 to vector<16x128xf32>
    %21 = arith.mulf %20, %19 : vector<16x128xf32>
    %22 = arith.maximumf %19, %21 : vector<16x128xf32>
    %23 = arith.truncf %22 : vector<16x128xf32> to vector<16x128xbf16>
    %c0_11 = arith.constant 0 : index
    %c0_12 = arith.constant 0 : index
    %24 = vector.load %arg6[%c0_11, %c0_12] : memref<128x128xbf16, #tpu.memory_space<vmem>>, vector<128x128xbf16>
    %cst_13 = arith.constant dense<0.000000e+00> : vector<16x128xf32>
    %25 = tpu.matmul %23, %24, %cst_13 {dimension_numbers = #tpu.dot_dimension_numbers<[1], [0], [0], [1], [0, 0, 1, 1], [], []>} : vector<16x128xbf16>, vector<128x128xbf16>, vector<16x128xf32> -> vector<16x128xf32>
    %c0_14 = arith.constant 0 : index
    %c0_15 = arith.constant 0 : index
    %26 = vector.load %arg7[%c0_14, %c0_15] : memref<1x128xf32, #tpu.memory_space<vmem>>, vector<1x128xf32>
    %27 = vector.broadcast %26 : vector<1x128xf32> to vector<16x128xf32>
    %28 = arith.addf %25, %27 : vector<16x128xf32>
    %cst_16 = arith.constant 0.00999999977 : f32
    %29 = vector.broadcast %cst_16 : f32 to vector<16x128xf32>
    %30 = arith.mulf %29, %28 : vector<16x128xf32>
    %31 = arith.maximumf %28, %30 : vector<16x128xf32>
    %32 = arith.truncf %31 : vector<16x128xf32> to vector<16x128xbf16>
    %c0_17 = arith.constant 0 : index
    %c0_18 = arith.constant 0 : index
    %33 = vector.load %arg8[%c0_17, %c0_18] : memref<128x128xbf16, #tpu.memory_space<vmem>>, vector<128x128xbf16>
    %cst_19 = arith.constant dense<0.000000e+00> : vector<16x128xf32>
    %34 = tpu.matmul %32, %33, %cst_19 {dimension_numbers = #tpu.dot_dimension_numbers<[1], [0], [0], [1], [0, 0, 1, 1], [], []>} : vector<16x128xbf16>, vector<128x128xbf16>, vector<16x128xf32> -> vector<16x128xf32>
    %c0_20 = arith.constant 0 : index
    %c0_21 = arith.constant 0 : index
    %35 = vector.load %arg9[%c0_20, %c0_21] : memref<1x128xf32, #tpu.memory_space<vmem>>, vector<1x128xf32>
    %36 = vector.broadcast %35 : vector<1x128xf32> to vector<16x128xf32>
    %37 = arith.addf %34, %36 : vector<16x128xf32>
    %38 = arith.truncf %37 : vector<16x128xf32> to vector<16x128xbf16>
    %c0_22 = arith.constant 0 : index
    %c0_23 = arith.constant 0 : index
    %39 = vector.load %arg10[%c0_22, %c0_23] : memref<16x128xbf16, #tpu.memory_space<vmem>>, vector<16x128xbf16>
    tpu.vector_store %arg10[%c0_22, %c0_23], %38 {strides = array<i32>} : memref<16x128xbf16, #tpu.memory_space<vmem>>, vector<16x128xbf16>,
    return
  }
  func.func @transform_0(%arg0: i32) -> (i32, i32) {
    %c0_i32 = arith.constant 0 : i32
    %c0_i32_0 = arith.constant 0 : i32
    return %arg0, %c0_i32 : i32, i32
  }
  func.func @transform_1(%arg0: i32) -> (i32, i32) {
    %c0_i32 = arith.constant 0 : i32
    %c0_i32_0 = arith.constant 0 : i32
    return %arg0, %c0_i32 : i32, i32
  }
  func.func @transform_2(%arg0: i32) -> (i32, i32) {
    %c0_i32 = arith.constant 0 : i32
    %c0_i32_0 = arith.constant 0 : i32
    %c0_i32_1 = arith.constant 0 : i32
    return %c0_i32, %c0_i32_0 : i32, i32
  }
  func.func @transform_3(%arg0: i32) -> (i32, i32) {
    %c0_i32 = arith.constant 0 : i32
    %c0_i32_0 = arith.constant 0 : i32
    %c0_i32_1 = arith.constant 0 : i32
    return %c0_i32, %c0_i32_0 : i32, i32
  }
  func.func @transform_4(%arg0: i32) -> (i32, i32) {
    %c0_i32 = arith.constant 0 : i32
    %c0_i32_0 = arith.constant 0 : i32
    %c0_i32_1 = arith.constant 0 : i32
    return %c0_i32, %c0_i32_0 : i32, i32
  }
  func.func @transform_5(%arg0: i32) -> (i32, i32) {
    %c0_i32 = arith.constant 0 : i32
    %c0_i32_0 = arith.constant 0 : i32
    %c0_i32_1 = arith.constant 0 : i32
    return %c0_i32, %c0_i32_0 : i32, i32
  }
  func.func @transform_6(%arg0: i32) -> (i32, i32) {
    %c0_i32 = arith.constant 0 : i32
    %c0_i32_0 = arith.constant 0 : i32
    %c0_i32_1 = arith.constant 0 : i32
    return %c0_i32, %c0_i32_0 : i32, i32
  }
  func.func @transform_7(%arg0: i32) -> (i32, i32) {
    %c0_i32 = arith.constant 0 : i32
    %c0_i32_0 = arith.constant 0 : i32
    %c0_i32_1 = arith.constant 0 : i32
    return %c0_i32, %c0_i32_0 : i32, i32
  }
  func.func @transform_8(%arg0: i32) -> (i32, i32) {
    %c0_i32 = arith.constant 0 : i32
    %c0_i32_0 = arith.constant 0 : i32
    %c0_i32_1 = arith.constant 0 : i32
    return %c0_i32, %c0_i32_0 : i32, i32
  }
  func.func @transform_9(%arg0: i32) -> (i32, i32) {
    %c0_i32 = arith.constant 0 : i32
    %c0_i32_0 = arith.constant 0 : i32
    return %arg0, %c0_i32 : i32, i32
  }
}

</mosaic_0001>

<bundles_post_ra>
// kernel: tpu_custom_call.1
= control target key start
LH: loop header
LB: loop body
LE: loop exit
PB: predicated region body
PF: predicated region fallthrough
CT: control target
= control target key end

     0   :  { %14 = vsyncpa [#allocation3], 0  ;;  %s1936_s0 = inlined_call_operand.vmem [shape: f32[48,32], index: 0, kind: input, shape index: {}]   ;;  %s1937_s1 = inlined_call_operand.vmem [shape: f32[48,1], index: 1, kind: input, shape index: {}]   ;;  %s1938_s2 = inlined_call_operand.hbm [shape: bf16[32,128], index: 2, kind: input, shape index: {}]   ;;  %s1939_s3 = inlined_call_operand.vmem [shape: f32[2,128], index: 3, kind: input, shape index: {}]   ;;  %s1940_s4 = inlined_call_operand.vmem [shape: f32[1,128], index: 4, kind: input, shape index: {}]   ;;  %s1941_s5 = inlined_call_operand.vmem [shape: bf16[128,128], index: 5, kind: input, shape index: {}]   ;;  %s1942_s6 = inlined_call_operand.vmem [shape: f32[1,128], index: 6, kind: input, shape index: {}]   ;;  %s1943_s7 = inlined_call_operand.vmem [shape: bf16[128,128], index: 7, kind: input, shape index: {}]   ;;  %s1944_s8 = inlined_call_operand.vmem [shape: f32[1,128], index: 8, kind: input, shape index: {}]   ;;  %s1945_s9 = inlined_call_operand.hbm [shape: bf16[48,128], index: 9, kind: output, shape index: {}]  }
   0x1   :  { %15 = vsyncpa [#allocation4], 0 }
   0x2   :  { %17 = vsyncpa [#allocation4 + $0x1], 0  ;;  %s1636_s30 = smov 0   ;;  %s1638_s10 = smov 0  }
   0x3   :  { %s1640_s11 = smov 0   ;;  %s1642_s12 = smov 0  }
   0x4 LB: > { %s1657_s13 = sadd.s32 4294967295, %s1569_s12   ;;  %s1241_s14 = sadd.s32 4294967294, %s1569_s12   ;;  %s1569_s12 = sphi %s1642_s12, %s1961_s12   ;;  %s1565_s11 = sphi %s1640_s11, %s1960_s11   ;;  %s1561_s10 = sphi %s1638_s10, %s1959_s10   ;;  %s1557_s30 = sphi %s1636_s30, %s1958_s30  }
   0x5   : > { %s1661_s15 = sadd.s32 1, %s1569_s12   ;;  %s229_s16 = sadd.s32 1, %s1565_s11 }
   0x6   : > { %s226_s17 = ssub.s32 %s1569_s12, %s1661_s15  ;;  %p239_p0 = scmp.ne.s32.totalorder %s1565_s11, %s1561_s10 }
   0x7   : > { %p227_p1 = scmp.eq.s32.totalorder %s226_s17, 0  ;;  %p240_p2 = scmp.eq.s32.totalorder %s1657_s13, 2 }
   0x8   : > { %p245_p3 = scmp.ne.s32.totalorder %s1561_s10, %s1557_s30  ;;  %p246_p4 = scmp.eq.s32.totalorder %s1241_s14, 2 }
   0x9   : > { %s1672_s18 = scalar_select %p227_p1, %s1565_s11, %s229_s16  }
   0xa   : > { %p1674_p5 = por %p240_p2, %p239_p0  ;;  %p1678_p6 = por %p246_p4, %p245_p3 }
   0xb   : > { %p1242_p7 = scmp.ge.s32.totalorder %s1569_s12, 1  ;;  %p253_p8 = scmp.lt.s32.totalorder %s1569_s12, 4 }
   0xc   : > { %s1949_s19 = scalar_select %p1674_p5, 1, 0 }
   0xd   : > { %s1950_s20 = scalar_select %p1678_p6, 1, 0 }
   0xe   : > { %p1946_p9 = scmp.eq.s32.totalorder %s1657_s13, 0  ;;  %p1685_p10 = pnand %p1242_p7, %p253_p8 }
   0xf   : > { %s1571_s22 = smov [#allocation2]   ;;  %s1475_s27 = scalar_lea.hbm %s1938_s2, 256 }
  0x10   : > { %s1951_s21 = scalar_select %p1685_p10, 1, 0 }
  0x11   : > { %s265_s23 = sshll.u32 %s1571_s22, 4  ;;  %p1390_p11 = pneg %p1685_p10  ;;  %s266_s23 = int_to_ptr.vmem [resolvable:$true] %s265_s23 }
  0x12   : > { %p1476_p13 = scmp.ne.s32.totalorder %s1938_s2, %s1475_s27  ;;  %p1482_p3 = scmp.lt.u32.totalorder %s1475_s27, %s1938_s2 }
  0x13   : > { %p1693_p12 = pnand %p1946_p9, %p1390_p11 }
  0x15   : > { %p1477_p0 = pneg %p1693_p12 }
  0x17   : > { %p1478_p1 = pnand %p1477_p0, %p1476_p13 }
  0x19   : > { %p1479_p2 = pneg %p1478_p1 }
  0x1b   : > { %p1484_p4 = pnand %p1482_p3, %p1479_p2 }
  0x1d   : > { %1487 = shalt.err (!%p1484_p4)
}
  0x1e   : > { %s1488_s17 = scalar_lea.vmem %s266_s23, 256  ;;  %p1496_p9 = scmp.lt.s32.totalorder %s266_s23, %s266_s23 }
  0x1f   : > { %p1489_p7 = scmp.ne.s32.totalorder %s266_s23, %s1488_s17  ;;  %p1497_p6 = scmp.lt.s32.totalorder %s1488_s17, %s1488_s17 }
  0x21   : > { %p1491_p8 = pnand %p1489_p7, %p1477_p0  ;;  %p1498_p5 = por %p1497_p6, %p1496_p9 }
  0x23   : > { %p1492_p11 = pneg %p1491_p8 }
  0x25   : > { %p1499_p10 = pnand %p1498_p5, %p1492_p11 }
  0x27   : > { %1502 = shalt.err (!%p1499_p10)
}
  0x28   : > { %s1572_s22 = smov 64   ;;  %s1573_s25 = smov 4  }
  0x29   : > { %1393 = dma.hbm_to_vmem [thread:$0]  (!%p1693_p12), %s1938_s2, 256, %s266_s23, [#allocation3], %s1572_s22, %s1572_s22, %s1573_s25  }
  0x2a   : > { %p1953_p13 = scmp.ne.s32.totalorder %s1951_s21, 0 }
  0x2b   : > { %p1954_p1 = scmp.eq.s32.totalorder (!%p1953_p13), %s1657_s13, 0 }
  0x2c   : > { %317 = sbr.rel (%p1953_p13) target bundleno = 746 (0x2ea), region = 56 }
  0x33   : > { %1548 = dma.done.wait (%p1954_p1), [#allocation3], 256   ;;  %p1955_p0 = pmov %p1954_p1 }
  0x34   : > { %s1248_s27 = sshll.u32 %s1657_s13, 1  ;;  %v1574_v0 = vmov 0.0   ;;  %vm1575_vm0 = vmmov 0   ;;  %v1576_v1 = vmov 0   ;;  %v1449_v2 = vld [vmem:[#allocation2] sm:$0xff]   ;;  %v1450_v3 = vld [vmem:[#allocation2 + $0x8] sm:$0xff]  }
  0x35   : > { %1550 = vsyncadd (%p1955_p0), [#allocation3], 4294967040  ;;  %1328 = vmatprep.subr.bf16.mxu0 %v1574_v0  ;;  %1332 = vmatprep.mubr.msk.bf16.mxu0 %vm1575_vm0, %v1574_v0  ;;  %p359_p5 = scmp.lt.s32.totalorder %s1248_s27, 5  ;;  %v1451_v10 = vld [vmem:[%s1941_s5] sm:$0xff]   ;;  %v1452_v16 = vld [vmem:[%s1941_s5 + $0x8] sm:$0xff]   ;;  %vm824_vm1 = vcmask 261120  }
  0x36   : > { %1447 = vset.pattern.permute.xlu0 %v1576_v1  ;;  %1448 = vset.pattern.permute.xlu1 %v1576_v1  ;;  %v1453_v24 = vld [vmem:[%s1941_s5 + $0x10] sm:$0xff]   ;;  %v1577_v35 = vmov 683565275   ;;  %v1578_v37 = vmov 2475754826   ;;  %s1301_s16 = sshll.u32 %s1657_s13, 7 }
  0x37   : > { %s1963_s27 = smov (!%p359_p5, %s1248_s27), 5  ;;  %1336 = vmatprep.subr.bf16.mxu1 %v1574_v0  ;;  %1352 = vmatprep.mubr.msk.bf16.mxu1 %vm1575_vm0, %v1574_v0  ;;  %v1579_v39 = vmov 2131351028   ;;  %v1580_v41 = vmov 2102212464   ;;  %s1893_s25 = scalar_lea.hbm %s1945_s9, %s1301_s16 }
  0x38   : > { %s1249_s21 = sshll.u32 %s1963_s27, 3  ;;  %1329 = vmatpush3.bf16.msra.mxu0 %v1449_v2  ;;  %1337 = vmatpush3.bf16.msra.mxu1 %v1451_v10  ;;  %v1581_v43 = vmov 920167782   ;;  %v1582_v50 = vmov 1326507024   ;;  %s355_s27 = sand.u32 1, %s1561_s10  }
  0x39   : > { %s362_s29 = scalar_lea.vmem %s1936_s0, %s1249_s21  ;;  %s368_s17 = scalar_lea.vmem %s1937_s1, %s1249_s21  ;;  %1330 = vmatprep.subr.bf16.mxu0 %v1574_v0  ;;  %1338 = vmatprep.subr.bf16.mxu1 %v1574_v0 }
  0x3a   : > { %v372_v4 = vld [vmem:[%s362_s29] sm:$0xff]  ;;  %v373_v5 = vld [vmem:[%s362_s29 + $0x8] sm:$0xff]  ;;  %s1247_s21 = sshll.u32 %s355_s27, 3  ;;  %s1895_s26 = scalar_lea.sflag [#allocation4], %s355_s27 }
  0x3b   : > { %v1732_v6 = vld [vmem:[%s368_s17] sm:$0xff]  ;;  %v1737_v9 = vld [vmem:[%s368_s17 + $0x8] sm:$0xff]  ;;  %v790_v13 = vpack.c.bf16 %v373_v5, %v372_v4  ;;  %s357_s29 = scalar_lea.vmem [#allocation5], %s1247_s21  ;;  %p1956_p9 = scmp.ne.s32.totalorder %s1949_s19, 0 }
  0x3c   : > { %v376_v7 = vand.u32 2147483647, %v1732_v6  ;;  %v379_v8 = vand.u32 2139095040, %v1732_v6  ;;  %v480_v11 = vand.u32 2147483647, %v1737_v9  ;;  %v483_v12 = vand.u32 2139095040, %v1737_v9  ;;  %1331 = vmatpush3.bf16.msra.mxu0 %v1450_v3  ;;  %1339 = vmatpush3.bf16.msra.mxu1 %v1452_v16 }
  0x3d   : > { %1356 = vmatprep.subr.bf16.mxu0 %v1574_v0  ;;  %1340 = vmatprep.subr.bf16.mxu1 %v1574_v0  ;;  %s1155_s14 = sshll.u32 %s357_s29, 4  ;;  %s1583_s13 = smov [#allocation5]   ;;  %s1888_s14 = int_to_ptr.vmem [resolvable:$true] %s1155_s14 }
  0x3e   : > { %v380_v14 = vshrl.u32 %v379_v8, 23  ;;  %v383_v15 = vand.u32 8388607, %v376_v7  ;;  %v484_v17 = vshrl.u32 %v483_v12, 23  ;;  %v487_v18 = vand.u32 8388607, %v480_v11 }
  0x3f   : > { %1333 = vmatmul.mubr.msk.bf16.vlgmr.msra.gmra.mrb[0].mxu0 %vm824_vm1, %v790_v13  ;;  %vm377_vm1 = vcmp.le.f32.partialorder %v376_v7, 0.7853982  ;;  %s1503_s28 = scalar_lea.vmem %s1888_s14, 128  ;;  %s1507_s21 = sshll.u32 %s1583_s13, 4  ;;  %s1508_s21 = int_to_ptr.vmem [resolvable:$false] %s1507_s21 }
  0x40   : > { %v1252_v19 = vadd.s32 4294967169, %v380_v14  ;;  %v384_v20 = vor.u32 8388608, %v383_v15  ;;  %v1256_v21 = vadd.s32 4294967169, %v484_v17  ;;  %v488_v23 = vor.u32 8388608, %v487_v18  ;;  %1372 = vmatprep.mubr.msk.bf16.mxu0 %vm1575_vm0, %v1574_v0  ;;  %1341 = vmatpush3.bf16.msra.mxu1 %v1453_v24  ;;  %p1504_p6 = scmp.ne.s32.totalorder %s1888_s14, %s1503_s28  ;;  %s1509_s23 = scalar_lea.vmem %s1508_s21, 256 }
  0x41   : > { %1342 = vmatprep.subr.bf16.mxu1 %v1574_v0  ;;  %vm378_vm0 = vcmp.lt.s32.totalorder %v1732_v6, 0  ;;  %p1510_p2 = scmp.lt.s32.totalorder %s1888_s14, %s1508_s21  ;;  %p1511_p3 = scmp.lt.s32.totalorder %s1509_s23, %s1503_s28 }
  0x42   : > { %v386_v22 = vadd.s32 1, %v1252_v19  ;;  %v490_v25 = vadd.s32 1, %v1256_v21  ;;  %v1759_v26 = vshll.u32 %v384_v20, 8  ;;  %v1761_v31 = vshll.u32 %v488_v23, 8  ;;  %p1505_p10 = pnand %p1504_p6, %p1956_p9 }
  0x43   : > { %p1512_p4 = por %p1511_p3, %p1510_p2 }
  0x44   : > { %vm387_vm2 = vcmp.gt.s32.totalorder %v386_v22, 0  ;;  %vm491_vm3 = vcmp.gt.s32.totalorder %v490_v25, 0  ;;  %p1506_p12 = pneg %p1505_p10 }
  0x45   : > { %v388_v27 = vsel %vm387_vm2, %v386_v22, 0  ;;  %v492_v30 = vsel %vm491_vm3, %v490_v25, 0  ;;  %vm482_vm2 = vcmp.lt.s32.totalorder %v1737_v9, 0  ;;  %vm481_vm3 = vcmp.le.f32.partialorder %v480_v11, 0.7853982 }
  0x46   : > { %v389_v28 = vshrl.u32 %v388_v27, 5  ;;  %v390_v29 = vand.u32 31, %v388_v27  ;;  %v1763_v32 = vshrl.u32 %v492_v30, 5  ;;  %v494_v33 = vand.u32 31, %v492_v30  ;;  %p1513_p7 = pnand %p1512_p4, %p1506_p12 }
  0x48   : > { %v391_v34 = vsub.s32 32, %v390_v29  ;;  %v393_v36 = vshll.u32 %v1577_v35, %v390_v29  ;;  %v396_v38 = vshll.u32 %v1578_v37, %v390_v29  ;;  %v399_v40 = vshll.u32 %v1579_v39, %v390_v29 }
  0x49   : > { %v402_v42 = vshll.u32 %v1580_v41, %v390_v29  ;;  %v405_v44 = vshll.u32 %v1581_v43, %v390_v29  ;;  %vm408_vm4 = vcmp.lt.s32.totalorder %v389_v28, 1  ;;  %vm409_vm5 = vcmp.lt.s32.totalorder %v389_v28, 2 }
  0x4a   : > { %v392_v45 = vshrl.u32 %v1577_v35, %v391_v34  ;;  %v394_v46 = vshrl.u32 %v1578_v37, %v391_v34  ;;  %v397_v47 = vshrl.u32 %v1579_v39, %v391_v34  ;;  %v400_v48 = vshrl.u32 %v1580_v41, %v391_v34 }
  0x4b   : > { %v403_v49 = vshrl.u32 %v1581_v43, %v391_v34  ;;  %v406_v51 = vshrl.u32 %v1582_v50, %v391_v34  ;;  %vm410_vm6 = vcmp.lt.s32.totalorder %v389_v28, 3  ;;  %vm411_vm7 = vcmp.lt.s32.totalorder %v389_v28, 4 }
  0x4c   : > { %v395_v52 = vor.u32 %v394_v46, %v393_v36  ;;  %v398_v53 = vor.u32 %v397_v47, %v396_v38  ;;  %v401_v54 = vor.u32 %v400_v48, %v399_v40  ;;  %v495_v55 = vsub.s32 32, %v494_v33 }
  0x4d   : > { %v404_v56 = vor.u32 %v403_v49, %v402_v42  ;;  %v407_v57 = vor.u32 %v406_v51, %v405_v44  ;;  %v497_v58 = vshll.u32 %v1577_v35, %v494_v33  ;;  %v500_v3 = vshll.u32 %v1578_v37, %v494_v33 }
  0x4e   : > { %v412_v59 = vsel %vm408_vm4, %v392_v45, %v395_v52  ;;  %v413_v60 = vsel %vm411_vm7, %v401_v54, 2102212464  ;;  %v416_v61 = vsel %vm408_vm4, %v395_v52, %v398_v53  ;;  %v420_v62 = vsel %vm408_vm4, %v398_v53, %v401_v54 }
  0x4f   : > { %v414_v63 = vsel %vm410_vm6, %v398_v53, %v413_v60  ;;  %v417_v1 = vsel %vm411_vm7, %v404_v56, 920167782  ;;  %v421_v2 = vsel %vm411_vm7, %v407_v57, 1326507024  ;;  %v496_v8 = vshrl.u32 %v1577_v35, %v495_v55 }
  0x50   : > { %v418_v4 = vsel %vm410_vm6, %v401_v54, %v417_v1  ;;  %v422_v5 = vsel %vm410_vm6, %v404_v56, %v421_v2  ;;  %v498_v10 = vshrl.u32 %v1578_v37, %v495_v55  ;;  %v415_v12 = vsel %vm409_vm5, %v412_v59, %v414_v63 }
  0x51   : > { %v419_v13 = vsel %vm409_vm5, %v416_v61, %v418_v4  ;;  %v423_v14 = vsel %vm409_vm5, %v420_v62, %v422_v5  ;;  %v501_v15 = vshrl.u32 %v1579_v39, %v495_v55  ;;  %v503_v22 = vshll.u32 %v1579_v39, %v494_v33 }
  0x52   : > { %v1776_v16 = vmul.u32.u64.low %v1759_v26, %v423_v14  ;;  %v1777_v17 = vmul.u32.u64.high %v1759_v26, %v423_v14, %v1776_v16  ;;  %v1780_v18 = vmul.u32.u64.low %v1759_v26, %v419_v13  ;;  %v1781_v19 = vmul.u32.u64.high %v1759_v26, %v419_v13, %v1780_v18 }
  0x53   : > { %v499_v20 = vor.u32 %v498_v10, %v497_v58  ;;  %v502_v21 = vor.u32 %v501_v15, %v500_v3  ;;  %v504_v23 = vshrl.u32 %v1580_v41, %v495_v55  ;;  %v506_v24 = vshll.u32 %v1580_v41, %v494_v33 }
  0x54   : > { %v507_v25 = vshrl.u32 %v1581_v43, %v495_v55  ;;  %v509_v27 = vshll.u32 %v1581_v43, %v494_v33  ;;  %v510_v29 = vshrl.u32 %v1582_v50, %v495_v55  ;;  %v431_v28 = vmul.u32 %v1759_v26, %v415_v12 }
  0x55   : > { %v505_v30 = vor.u32 %v504_v23, %v503_v22  ;;  %vm512_vm8 = vcmp.lt.s32.totalorder %v1763_v32, 1  ;;  %vm513_vm9 = vcmp.lt.s32.totalorder %v1763_v32, 2  ;;  %vm433_vm10 = vc.u32 %v1777_v17, %v1780_v18 }
  0x56   : > { %v434_v34 = vadd.s32 1, %v1781_v19  ;;  %v508_v35 = vor.u32 %v507_v25, %v506_v24  ;;  %vm514_vm11 = vcmp.lt.s32.totalorder %v1763_v32, 3  ;;  %v511_v36 = vor.u32 %v510_v29, %v509_v27 }
  0x57   : > { %vm515_vm12 = vcmp.lt.s32.totalorder %v1763_v32, 4  ;;  %v516_v37 = vsel %vm512_vm8, %v496_v8, %v499_v20  ;;  %v520_v33 = vsel %vm512_vm8, %v499_v20, %v502_v21  ;;  %v524_v40 = vsel %vm512_vm8, %v502_v21, %v505_v30 }
  0x58   : > { %v435_v38 = vsel %vm433_vm10, %v434_v34, %v1781_v19  ;;  %v517_v26 = vsel %vm515_vm12, %v505_v30, 2102212464  ;;  %v521_v39 = vsel %vm515_vm12, %v508_v35, 920167782  ;;  %v525_v44 = vsel %vm515_vm12, %v511_v36, 1326507024 }
  0x59   : > { %v436_v41 = vadd.s32 %v435_v38, %v431_v28  ;;  %v518_v42 = vsel %vm514_vm11, %v502_v21, %v517_v26  ;;  %v522_v43 = vsel %vm514_vm11, %v505_v30, %v521_v39  ;;  %v526_v47 = vsel %vm514_vm11, %v508_v35, %v525_v44 }
  0x5a   : > { %v519_v45 = vsel %vm513_vm9, %v516_v37, %v518_v42  ;;  %v523_v46 = vsel %vm513_vm9, %v520_v33, %v522_v43  ;;  %v527_v49 = vsel %vm513_vm9, %v524_v40, %v526_v47  ;;  %v432_v5 = vadd.s32 %v1780_v18, %v1777_v17 }
  0x5b   : > { %v437_v48 = vadd.s32 536870912, %v436_v41  ;;  %v1798_v50 = vmul.u32.u64.low %v1761_v31, %v523_v46  ;;  %v1799_v51 = vmul.u32.u64.high %v1761_v31, %v523_v46, %v1798_v50  ;;  %v535_v55 = vmul.u32 %v1761_v31, %v519_v45 }
  0x5c   : > { %v1802_v52 = vmul.u32.u64.low %v1761_v31, %v527_v49  ;;  %v1803_v53 = vmul.u32.u64.high %v1761_v31, %v527_v49, %v1802_v52  ;;  %vm468_vm10 = vweird.f32 %v1732_v6 }
  0x5d   : > { %v438_v54 = vshrl.u32 %v437_v48, 30  ;;  %v538_v57 = vadd.s32 1, %v1799_v51 }
  0x5e   : > { %vm537_vm13 = vc.u32 %v1803_v53, %v1798_v50  ;;  %v536_v25 = vadd.s32 %v1798_v50, %v1803_v53 }
  0x5f   : > { %v439_v56 = vshll.u32 %v438_v54, 30  ;;  %v539_v32 = vsel %vm537_vm13, %v538_v57, %v1799_v51  ;;  %v462_v17 = vsub.s32 4, %v438_v54 }
  0x60   : > { %v540_v59 = vadd.s32 %v539_v32, %v535_v55 }
  0x61   : > { %v440_v58 = vsub.s32 %v436_v41, %v439_v56  ;;  %v463_v33 = vsel %vm378_vm0, %v462_v17, %v438_v54  ;;  %v1462_v17 = vld [vmem:[%s1943_s7 + $0x18] sm:$0xff]  }
  0x62   : > { %v541_v61 = vadd.s32 536870912, %v540_v59  ;;  %v465_v41 = vsel %vm377_vm1, 0, %v463_v33 }
  0x63   : > { %v442_v60 = vsub.s32 0, %v440_v58  ;;  %v469_v46 = vadd.s32 3, %v465_v41  ;;  %v677_v50 = vand.u32 3, %v465_v41 }
  0x64   : > { %v542_v63 = vshrl.u32 %v541_v61, 30 }
  0x65   : > { %v1253_v62 = vmin.u32 %v442_v60, %v440_v58  ;;  %v470_v49 = vand.u32 3, %v469_v46  ;;  %vm682_vm5 = vcmp.eq.s32.totalorder %v677_v50, 2  ;;  %vm679_vm7 = vcmp.eq.s32.totalorder %v677_v50, 0 }
  0x66   : > { %v543_v2 = vshll.u32 %v542_v63, 30  ;;  %v566_v45 = vsub.s32 4, %v542_v63  ;;  %vm678_vm9 = vcmp.lt.s32.totalorder %v677_v50, 2 }
  0x67   : > { %v444_v1 = vclz %v1253_v62  ;;  %vm475_vm4 = vcmp.eq.s32.totalorder %v470_v49, 2  ;;  %vm472_vm6 = vcmp.eq.s32.totalorder %v470_v49, 0  ;;  %vm471_vm8 = vcmp.lt.s32.totalorder %v470_v49, 2 }
  0x68   : > { %v544_v4 = vsub.s32 %v540_v59, %v543_v2  ;;  %v567_v48 = vsel %vm482_vm2, %v566_v45, %v542_v63 }
  0x69   : > { %v1254_v3 = vadd.s32 4294967294, %v444_v1  ;;  %v569_v53 = vsel %vm481_vm3, 0, %v567_v48 }
  0x6a   : > { %v546_v8 = vsub.s32 0, %v544_v4  ;;  %v573_v57 = vadd.s32 3, %v569_v53  ;;  %v780_v1 = vand.u32 3, %v569_v53 }
  0x6b   : > { %vm1255_vm14 = vcmp.lt.s32.totalorder %v1254_v3, 0 }
  0x6c   : > { %v447_v31 = vsel %vm1255_vm14, 0, %v1254_v3  ;;  %v1257_v14 = vmin.u32 %v546_v8, %v544_v4  ;;  %v574_v63 = vand.u32 3, %v573_v57  ;;  %vm785_vm12 = vcmp.eq.s32.totalorder %v780_v1, 2  ;;  %v1274_v57 = vld [vmem:[%s1942_s6] ss:$0 sm:$0xff] }
  0x6d   : > { %v448_v10 = vsub.s32 32, %v447_v31  ;;  %v449_v12 = vshll.u32 %v440_v58, %v447_v31  ;;  %v452_v13 = vsub.s32 4294967266, %v447_v31  ;;  %vm782_vm14 = vcmp.eq.s32.totalorder %v780_v1, 0 }
  0x6e   : > { %v548_v19 = vclz %v1257_v14  ;;  %vm579_vm11 = vcmp.eq.s32.totalorder %v574_v63, 2  ;;  %vm576_vm13 = vcmp.eq.s32.totalorder %v574_v63, 0 }
  0x6f   : > { %v450_v15 = vshrl.u32 %v432_v5, %v448_v10  ;;  %v453_v16 = vadd.s32 127, %v452_v13 }
  0x70   : > { %v1258_v22 = vadd.s32 4294967294, %v548_v19 }
  0x71   : > { %v451_v20 = vor.u32 %v450_v15, %v449_v12  ;;  %v454_v21 = vshll.u32 %v453_v16, 23 }
  0x72   : > { %vm1259_vm15 = vcmp.lt.s32.totalorder %v1258_v22, 0 }
  0x73   : > { %v455_v23 = vor.u32 4788187, %v454_v21  ;;  %v458_v24 = vcvt.s32.f32 %v451_v20  ;;  %v551_v18 = vsel %vm1259_vm15, 0, %v1258_v22  ;;  %vm575_vm15 = vcmp.lt.s32.totalorder %v574_v63, 2  ;;  %v1455_v21 = vld [vmem:[%s1941_s5 + $0x20] sm:$0xff]   ;;  %v1457_v22 = vld [vmem:[%s1941_s5 + $0x30] sm:$0xff]  }
  0x74   : > { %v552_v29 = vsub.s32 32, %v551_v18  ;;  %v553_v28 = vshll.u32 %v544_v4, %v551_v18  ;;  %v556_v30 = vsub.s32 4294967266, %v551_v18  ;;  %v1454_v4 = vld [vmem:[%s1941_s5 + $0x18] sm:$0xff]   ;;  %v1463_v18 = vld [vmem:[%s1943_s7 + $0x20] sm:$0xff]  }
  0x75   : > { %v456_v27 = vand.u32 2147483647, %v455_v23  ;;  %1343 = vmatpush3.bf16.msra.mxu1 %v1454_v4  ;;  %v1458_v23 = vld [vmem:[%s1941_s5 + $0x38] sm:$0xff]  }
  0x76   : > { %v554_v35 = vshrl.u32 %v536_v25, %v552_v29  ;;  %v557_v36 = vadd.s32 127, %v556_v30  ;;  %1344 = vmatprep.subr.bf16.mxu1 %v1574_v0  ;;  %v1460_v25 = vld [vmem:[%s1943_s7 + $0x8] sm:$0xff]   ;;  %v1268_v30 = vld [vmem:[%s1939_s3] ss:$0 sm:$0xff] }
  0x77   : > { %v459_v34 = vmul.f32 %v458_v24, %v456_v27  ;;  %v1459_v24 = vld [vmem:[%s1943_s7] sm:$0xff]   ;;  %v1461_v27 = vld [vmem:[%s1943_s7 + $0x10] sm:$0xff]  }
  0x78   : > { %v555_v38 = vor.u32 %v554_v35, %v553_v28  ;;  %v558_v26 = vshll.u32 %v557_v36, 23  ;;  %1357 = vmatpush3.bf16.msra.mxu0 %v1459_v24 }
  0x79   : > { %v460_v37 = vxor.u32 2147483648, %v459_v34  ;;  %1345 = vmatpush3.bf16.msra.mxu1 %v1455_v21  ;;  %1358 = vmatprep.subr.bf16.mxu0 %v1574_v0 }
  0x7a   : > { %v559_v42 = vor.u32 4788187, %v558_v26  ;;  %v562_v43 = vcvt.s32.f32 %v555_v38  ;;  %1346 = vmatprep.subr.bf16.mxu1 %v1574_v0 }
  0x7b   : > { %v461_v39 = vsel %vm378_vm0, %v460_v37, %v459_v34  ;;  %vm781_vm0 = vcmp.lt.s32.totalorder %v780_v1, 2  ;;  %v1272_v34 = vld [vmem:[%s1939_s3 + $0x1] ss:$0 sm:$0xff] }
  0x7c   : > { %v464_v40 = vsel %vm377_vm1, %v1732_v6, %v461_v39  ;;  %v560_v44 = vand.u32 2147483647, %v559_v42  ;;  %vm572_vm1 = vweird.f32 %v1737_v9  ;;  %1359 = vmatpush3.bf16.msra.mxu0 %v1460_v25 }
  0x7d   : > { %1467 = vcosq.f32 %v464_v40  ;;  %1360 = vmatprep.subr.bf16.mxu0 %v1574_v0 }
  0x7e   : > { %1469 = vsinq.f32 %v464_v40  ;;  %v563_v47 = vmul.f32 %v562_v43, %v560_v44  ;;  %v1273_v40 = vld [vmem:[%s1940_s4] ss:$0 sm:$0xff] }
  0x80   : > { %v564_v7 = vxor.u32 2147483648, %v563_v47  ;;  %1361 = vmatpush3.bf16.msra.mxu0 %v1461_v27 }
  0x81   : > { %1362 = vmatprep.subr.bf16.mxu0 %v1574_v0 }
  0x82   : > { %v565_v51 = vsel %vm482_vm2, %v564_v7, %v563_v47 }
  0x83   : > { %v568_v52 = vsel %vm481_vm3, %v1737_v9, %v565_v51  ;;  %v1456_v9 = vld [vmem:[%s1941_s5 + $0x28] sm:$0xff]  }
  0x84   : > { %1471 = vcosq.f32 %v568_v52  ;;  %1347 = vmatpush3.bf16.msra.mxu1 %v1456_v9  ;;  %1363 = vmatpush3.bf16.msra.mxu0 %v1462_v17 }
  0x85   : > { %1473 = vsinq.f32 %v568_v52  ;;  %1348 = vmatprep.subr.bf16.mxu1 %v1574_v0  ;;  %1364 = vmatprep.subr.bf16.mxu0 %v1574_v0 }
  0x87   : > { %v1468_v54 = vpop.eup %1467 }
  0x88   : > { %v1470_v55 = vpop.eup %1469  ;;  %v476_v56 = vxor.u32 2147483648, %v1468_v54  ;;  %1349 = vmatpush3.bf16.msra.mxu1 %v1457_v22  ;;  %1365 = vmatpush3.bf16.msra.mxu0 %v1463_v18 }
  0x89   : > { %v473_v11 = vxor.u32 2147483648, %v1470_v55  ;;  %1350 = vmatprep.subr.bf16.mxu1 %v1574_v0  ;;  %1366 = vmatprep.subr.bf16.mxu0 %v1574_v0 }
  0x8a   : > { %v477_v58 = vsel %vm475_vm4, %v476_v56, %v1470_v55  ;;  %v684_v32 = vsel %vm682_vm5, %v476_v56, %v1470_v55  ;;  %v1465_v55 = vld [vmem:[%s1943_s7 + $0x30] sm:$0xff]   ;;  %v1466_v56 = vld [vmem:[%s1943_s7 + $0x38] sm:$0xff]  }
  0x8b   : > { %v474_v59 = vsel %vm472_vm6, %v1468_v54, %v473_v11  ;;  %v681_v60 = vsel %vm679_vm7, %v1468_v54, %v473_v11  ;;  %v1464_v54 = vld [vmem:[%s1943_s7 + $0x28] sm:$0xff]  }
  0x8c   : > { %v478_v61 = vsel %vm471_vm8, %v474_v59, %v477_v58  ;;  %v685_v62 = vsel %vm678_vm9, %v681_v60, %v684_v32  ;;  %1351 = vmatpush3.bf16.msra.mxu1 %v1458_v23  ;;  %1367 = vmatpush3.bf16.msra.mxu0 %v1464_v54 }
  0x8d   : > { %v479_v2 = vsel %vm468_vm10, nan, %v478_v61  ;;  %v686_v3 = vsel %vm468_vm10, nan, %v685_v62  ;;  %1368 = vmatprep.subr.bf16.mxu0 %v1574_v0 }
  0x8e   : > { %798 = vperm.xlu0 %1447, %v479_v2   ;;  %872 = vperm.xlu1 %1448, %v686_v3   ;;  %v1472_v5 = vpop.eup %1471  ;;  %v1283_v3 = vld [vmem:[%s1944_s8] ss:$0 sm:$0xff] }
  0x8f   : > { %v1474_v6 = vpop.eup %1473  ;;  %v580_v31 = vxor.u32 2147483648, %v1472_v5 }
  0x90   : > { %v577_v8 = vxor.u32 2147483648, %v1474_v6  ;;  %1369 = vmatpush3.bf16.msra.mxu0 %v1465_v55 }
  0x91   : > { %v581_v10 = vsel %vm579_vm11, %v580_v31, %v1474_v6  ;;  %v787_v12 = vsel %vm785_vm12, %v580_v31, %v1474_v6  ;;  %1370 = vmatprep.subr.bf16.mxu0 %v1574_v0 }
  0x92   : > { %v578_v13 = vsel %vm576_vm13, %v1472_v5, %v577_v8  ;;  %v784_v14 = vsel %vm782_vm14, %v1472_v5, %v577_v8 }
  0x93   : > { %v582_v15 = vsel %vm575_vm15, %v578_v13, %v581_v10  ;;  %v788_v16 = vsel %vm781_vm0, %v784_v14, %v787_v12 }
  0x94   : > { %v583_v19 = vsel %vm572_vm1, nan, %v582_v15  ;;  %v789_v20 = vsel %vm572_vm1, nan, %v788_v16  ;;  %1371 = vmatpush3.bf16.msra.mxu0 %v1466_v56 }
  0x95   : > { %803 = vperm.xlu0 %1447, %v583_v19   ;;  %877 = vperm.xlu1 %1448, %v789_v20  }
 0x10d   : > { %v799_v29 = vpop.permute.xlu0 %798  ;;  %v873_v28 = vpop.permute.xlu1 %872 }
 0x10e   : > { %v810_v35 = vmul.f32 %v1268_v30, %v799_v29  ;;  %v884_v37 = vmul.f32 %v1272_v34, %v873_v28 }
 0x112   : > { %v862_v36 = vpop.f32.mrb[0].mxu0 }
 0x113   : > { %v863_v26 = vadd.f32 %v862_v36, %v810_v35  ;;  %v1334_v41 = vpop.f32.mrb[1].mxu0 }
 0x114   : > { %v804_v33 = vpop.permute.xlu0 %803  ;;  %v878_v38 = vpop.permute.xlu1 %877 }
 0x115   : > { %v811_v39 = vmul.f32 %v1268_v30, %v804_v33  ;;  %v886_v42 = vadd.f32 %v884_v37, %v863_v26  ;;  %v865_v43 = vpop.f32.mrb[2].mxu0  ;;  %v885_v44 = vmul.f32 %v1272_v34, %v878_v38 }
 0x116   : > { %v1335_v46 = vpop.f32.mrb[3].mxu0 }
 0x117   : > { %v866_v45 = vadd.f32 %v865_v43, %v811_v39  ;;  %v895_v47 = vadd.f32 %v1273_v40, %v886_v42 }
 0x119   : > { %v887_v7 = vadd.f32 %v885_v44, %v866_v45  ;;  %v897_v48 = vmul.f32 0.01, %v895_v47 }
 0x11b   : > { %v896_v49 = vadd.f32 %v1273_v40, %v887_v7  ;;  %v899_v51 = vmax.f32 %v895_v47, %v897_v48 }
 0x11d   : > { %v898_v50 = vmul.f32 0.01, %v896_v49 }
 0x11f   : > { %v900_v52 = vmax.f32 %v896_v49, %v898_v50 }
 0x121   : > { %v901_v53 = vpack.c.bf16 %v900_v52, %v899_v51 }
 0x123   : > { %1353 = vmatmul.mubr.bf16.vlgmr.msra.gmra.mrb[0].mxu1 %v901_v53 }
 0x1f6   : > { %v1007_v11 = vpop.f32.mrb[0].mxu1 }
 0x1f7   : > { %v1008_v58 = vadd.f32 %v1274_v57, %v1007_v11  ;;  %v1354_v32 = vpop.f32.mrb[1].mxu1 }
 0x1f8   : > { %v1010_v59 = vpop.f32.mrb[2].mxu1 }
 0x1f9   : > { %v1014_v60 = vmul.f32 0.01, %v1008_v58  ;;  %v1011_v61 = vadd.f32 %v1274_v57, %v1010_v59  ;;  %v1355_v62 = vpop.f32.mrb[3].mxu1 }
 0x1fb   : > { %v1015_v63 = vmul.f32 0.01, %v1011_v61  ;;  %v1016_v0 = vmax.f32 %v1008_v58, %v1014_v60 }
 0x1fd   : > { %v1017_v1 = vmax.f32 %v1011_v61, %v1015_v63 }
 0x1ff   : > { %v1018_v2 = vpack.c.bf16 %v1017_v1, %v1016_v0 }
 0x201   : > { %1373 = vmatmul.mubr.bf16.vlgmr.msra.gmra.mrb[4].mxu0 %v1018_v2 }
 0x2d4   : > { %v1124_v4 = vpop.f32.mrb[4].mxu0 }
 0x2d5   : > { %v1374_v5 = vpop.f32.mrb[5].mxu0  ;;  %v1125_v31 = vadd.f32 %v1283_v3, %v1124_v4 }
 0x2d6   : > { %v1127_v6 = vpop.f32.mrb[6].mxu0 }
 0x2d7   : > { %v1128_v8 = vadd.f32 %v1283_v3, %v1127_v6  ;;  %v1375_v10 = vpop.f32.mrb[7].mxu0 }
 0x2d9   : > { %v1305_v12 = vpack.c.bf16 %v1128_v8, %v1125_v31 }
 0x2db   : > { %1306 = vst [vmem:[%s357_s29] sm:$0xff] %v1305_v12  }
 0x2dc   : > { %1516 = shalt.err (!%p1513_p7)
}
 0x2dd   : > { %s1517_s27 = scalar_lea.hbm %s1893_s25, 128  ;;  %s1521_s16 = scalar_lea.hbm %s1945_s9, 384 }
 0x2de   : > { %p1518_p8 = scmp.ne.s32.totalorder %s1893_s25, %s1517_s27  ;;  %p1522_p1 = scmp.lt.u32.totalorder %s1893_s25, %s1945_s9 }
 0x2df   : > { %p1523_p0 = scmp.lt.u32.totalorder %s1521_s16, %s1517_s27  ;;  %p1525_p6 = scmp.lt.u32.totalorder %s1517_s27, %s1893_s25 }
 0x2e0   : > { %p1519_p11 = pnand %p1518_p8, %p1956_p9 }
 0x2e1   : > { %p1524_p5 = por %p1523_p0, %p1522_p1 }
 0x2e2   : > { %p1520_p13 = pneg %p1519_p11 }
 0x2e3   : > { %p1526_p10 = por %p1525_p6, %p1524_p5 }
 0x2e5   : > { %p1527_p12 = pnand %p1526_p10, %p1520_p13 }
 0x2e7   : > { %1530 = shalt.err (!%p1527_p12)
}
 0x2e8   : > { %s1584_s28 = smov 64   ;;  %s1585_s13 = smov 4  }
 0x2e9   : > { %1388 = dma.vmem_to_hbm [thread:$0]  (%p1956_p9), %s1888_s14, 128, %s1893_s25, %s1895_s26, %s1584_s28, %s1584_s28, %s1585_s13  }
 0x2ea PF: > { %p1400_p2 = scmp.ge.s32.totalorder %s1569_s12, 2  ;;  %s1170_s21 = sand.u32 1, %s1557_s30  }
 0x2eb   : > { %p1957_p3 = scmp.ne.s32.totalorder %s1950_s20, 0  ;;  %s1171_s23 = scalar_lea.sflag [#allocation4], %s1170_s21 }
 0x2ed   : > { %p1395_p4 = pnand %p1400_p2, %p1957_p3 }
 0x2ef   : > { %1552 = dma.done.wait (!%p1395_p4), %s1171_s23, 128  }
 0x2f0   : > { %1554 = vsyncadd (!%p1395_p4), %s1171_s23, 4294967168  ;;  %p20_p7 = scmp.ge.s32.totalorder %s1661_s15, 5   ;;  %s1958_s30 = smov %s1561_s10 }
 0x2f1   : > { %s1959_s10 = smov %s1565_s11  ;;  %s1960_s11 = smov %s1672_s18 }
 0x2f2   : > { %s1961_s12 = smov %s1661_s15  ;;  %22 = sbr.rel (!%p20_p7) target bundleno = 4 (0x4), region = 99 }
 0x2f9   :  { %1176 = vsyncpa [#allocation3], 1 }
 0x2fa   :  { %1178 = vsyncpa [#allocation3 + $0x1], 1 }
 0x2fb   :  { %1179 = vsyncpa [#allocation4], 1 }
 0x2fc   :  { %1181 = vsyncpa [#allocation4 + $0x1], 1 }

</bundles_post_ra>
